<compile_context>
chip_gen: v5e
topology: v5e:2x2
jax: 0.10.0
libtpu: 0.0.40
codegen_flags: <defaults>
</compile_context>

<pallas_src>
import functools

import jax
import jax.numpy as jnp
from jax.experimental import pallas as pl
from jax.experimental.pallas import tpu as pltpu


def _round_up(x, m):
    return ((x + m - 1) // m) * m


# ---------------------------------------------------------------------------
# Pass 1: factor = std * min positive pairwise distance.
# 1-D grid over upper-triangular (i, j) tile pairs (scalar-prefetched indices).
# ---------------------------------------------------------------------------
def _min_dist_kernel(i_idx_ref, j_idx_ref, xi_ref, xjt_ref, o_ref, acc_ref, *,
                     std):
    del i_idx_ref, j_idx_ref          # only consumed by the index_maps
    t = pl.program_id(0)
    nt = pl.num_programs(0)

    @pl.when(t == 0)
    def _init():
        acc_ref[...] = jnp.full(acc_ref.shape, jnp.inf, acc_ref.dtype)

    xi = xi_ref[...]                  # (T, D)
    xjt = xjt_ref[...]                # (D, T)
    ti, d = xi.shape
    tj = xjt.shape[1]

    # Explicit-difference squared distances: D broadcast FMAs, pure VPU.
    dist_sq = jnp.zeros((ti, tj), jnp.float32)
    for k in range(d):
        diff = xi[:, k:k + 1] - xjt[k:k + 1, :]       # (T,1)-(1,T) -> (T,T)
        dist_sq = dist_sq + diff * diff

    # Exact zeros for self-pairs / duplicates / padded replica rows -> mask out.
    masked = jnp.where(dist_sq > 0.0, dist_sq, jnp.inf)

    # Fold (T, T) -> (8, min(T,128)) with vreg-elementwise mins only (no XLU),
    # so the running-min accumulator is a single vreg instead of (T, T).
    part = masked[0:8, :]
    for r in range(1, ti // 8):
        part = jnp.minimum(part, masked[r * 8:(r + 1) * 8, :])
    if tj % 128 == 0 and tj > 128:
        fold = part[:, 0:128]
        for c in range(1, tj // 128):
            fold = jnp.minimum(fold, part[:, c * 128:(c + 1) * 128])
        part = fold

    acc_ref[...] = jnp.minimum(acc_ref[...], part)

    # Single cross-lane/sublane reduction + sqrt for the whole kernel.
    @pl.when(t == nt - 1)
    def _finalize():
        m = jnp.min(acc_ref[...], axis=1, keepdims=True)   # (8, 1)
        m = jnp.min(m, axis=0, keepdims=True)               # (1, 1)
        # Guard: no strictly positive distance (n <= 1 / all-identical points)
        # -> zero noise instead of inf/NaN (torch would raise on an empty min).
        o_ref[...] = jnp.where(m < jnp.inf, std * jnp.sqrt(m), 0.0)


# ---------------------------------------------------------------------------
# Pass 2: out = positions + noise * factor   (lane-dense flattened slab).
# ---------------------------------------------------------------------------
def _apply_noise_kernel(factor_ref, x_ref, noise_ref, o_ref):
    o_ref[...] = x_ref[...] + noise_ref[...] * factor_ref[0, 0]


def add_noise(x, std=0.1, key=None):
    """Pallas equivalent of AddNoise.forward. `x` is a dict with 'positions' (N, D)."""
    if key is None:
        key = jax.random.PRNGKey(0)
    positions = jnp.asarray(x["positions"], jnp.float32)
    n, d = positions.shape

    # ---- pass 1 tiling: rows only (D is never padded) ------------------------
    n8 = _round_up(max(n, 1), 8)
    tile = n8 if n8 <= 512 else 512           # 512: fewer grid steps, VMEM-safe
    n_pad = _round_up(max(n, 1), tile)
    ng = n_pad // tile

    # Pad rows by replicating the last real row: padded<->real distances
    # duplicate existing real ones and padded<->padded are exactly 0 (masked by
    # `> 0`), so the kernel needs no index masks at all.
    x_pad = jnp.pad(positions, ((0, n_pad - n), (0, 0)), mode="edge")
    x_padT = x_pad.T                          # (D, n_pad): row-broadcast source

    # 1-D grid over upper-triangular tile pairs only, i-major so the xi block
    # index repeats across consecutive steps (Pallas skips the re-DMA).
    pairs = [(i, j) for i in range(ng) for j in range(i, ng)]
    i_idx = jnp.asarray([p[0] for p in pairs], jnp.int32)
    j_idx = jnp.asarray([p[1] for p in pairs], jnp.int32)
    n_steps = len(pairs)

    acc_w = 128 if tile % 128 == 0 else tile

    factor = pl.pallas_call(
        functools.partial(_min_dist_kernel, std=float(std)),
        out_shape=jax.ShapeDtypeStruct((1, 1), jnp.float32),
        grid_spec=pltpu.PrefetchScalarGridSpec(
            num_scalar_prefetch=2,
            grid=(n_steps,),
            in_specs=[
                pl.BlockSpec((tile, d), lambda t, ii, jj: (ii[t], 0)),   # x_i
                pl.BlockSpec((d, tile), lambda t, ii, jj: (0, jj[t])),   # x_j^T
            ],
            out_specs=pl.BlockSpec((1, 1), lambda t, ii, jj: (0, 0)),
            scratch_shapes=[pltpu.VMEM((8, acc_w), jnp.float32)],
        ),
        compiler_params=pltpu.CompilerParams(
            dimension_semantics=("arbitrary",),   # shared running-min accumulator
            vmem_limit_bytes=32 * 1024 * 1024,
        ),
    )(i_idx, j_idx, x_pad, x_padT)

    # ---- pass 2: lane-dense elementwise apply ---------------------------------
    noise = jax.random.normal(key, (n, d), dtype=jnp.float32)  # ~ torch.randn_like
    total = n * d
    lanes = 128
    row_cap = 256
    if total <= row_cap * lanes:
        length = _round_up(max(total, 1), 8 * lanes)
        row_tile = length // lanes            # single grid step
    else:
        length = _round_up(total, row_cap * lanes)
        row_tile = row_cap
    rows = length // lanes

    pos_flat = jnp.pad(positions.reshape(-1), (0, length - total)).reshape(rows, lanes)
    noise_flat = jnp.pad(noise.reshape(-1), (0, length - total)).reshape(rows, lanes)

    out_flat = pl.pallas_call(
        _apply_noise_kernel,
        out_shape=jax.ShapeDtypeStruct((rows, lanes), jnp.float32),
        grid=(rows // row_tile,),
        in_specs=[
            pl.BlockSpec(memory_space=pltpu.MemorySpace.SMEM),     # scalar factor
            pl.BlockSpec((row_tile, lanes), lambda r: (r, 0)),     # positions
            pl.BlockSpec((row_tile, lanes), lambda r: (r, 0)),     # noise
        ],
        out_specs=pl.BlockSpec((row_tile, lanes), lambda r: (r, 0)),
        compiler_params=pltpu.CompilerParams(
            dimension_semantics=("parallel",),
            vmem_limit_bytes=32 * 1024 * 1024,
        ),
    )(factor, pos_flat, noise_flat)

    out = dict(x)
    out["positions"] = out_flat.reshape(-1)[:total].reshape(n, d)
    # transform = nn.Identity() in the reference module -> no-op.
    return out


if __name__ == "__main__":
    key = jax.random.PRNGKey(0)
    k_pos, k_noise = jax.random.split(key)

    N, D = 21, 3                       # small point cloud: 21 points in 3-D
    positions = jax.random.normal(k_pos, (N, D), dtype=jnp.float32)

    x = {"positions": positions}
    out = add_noise(x, std=0.1, key=k_noise)
    new_pos = jax.block_until_ready(out["positions"])

    # Shape / dtype / finiteness.
    assert new_pos.shape == (N, D) and new_pos.dtype == jnp.float32
    assert bool(jnp.all(jnp.isfinite(new_pos)))

    # Pure-JAX reference matching the torch module (same noise draw).
    diff = positions[:, None, :] - positions[None, :, :]
    dist = jnp.linalg.norm(diff, axis=-1)
    min_dist_ref = jnp.min(jnp.where(dist > 0, dist, jnp.inf))
    noise_ref = jax.random.normal(k_noise, (N, D), dtype=jnp.float32)
    expected = positions + noise_ref * 0.1 * min_dist_ref
    assert bool(jnp.allclose(new_pos, expected, atol=1e-5, rtol=1e-4)), (
        float(jnp.max(jnp.abs(new_pos - expected))))

    print("KERNEL_OK")
</pallas_src>

<mosaic_0001>
module attributes {stable_mosaic.version = 11 : i64} {
  func.func @_min_dist_kernel(%arg0: i32, %arg1: memref<1xi32, #tpu.memory_space<smem>>, %arg2: memref<1xi32, #tpu.memory_space<smem>>, %arg3: memref<24x3xf32, #tpu.memory_space<vmem>>, %arg4: memref<3x24xf32, #tpu.memory_space<vmem>>, %arg5: memref<1x1xf32, #tpu.memory_space<vmem>>, %arg6: memref<8x24xf32, #tpu.memory_space<vmem>>) attributes {dimension_semantics = [#tpu.dimension_semantics<arbitrary>], iteration_bounds = array<i64: 1>, scalar_prefetch = 2 : i64, scratch_operands = 1 : i64, tpu.core_type = #tpu.core_type<tc>, window_params = [{transform_indices = @transform_0, window_bounds = array<i64: 24, 3>}, {transform_indices = @transform_1, window_bounds = array<i64: 3, 24>}, {pipeline_mode = #tpu.pipeline_mode<synchronous>, transform_indices = @transform_2, window_bounds = array<i64: 1, 1>}]} {
    %c0_i32 = arith.constant 0 : i32
    %0 = arith.cmpi eq, %arg0, %c0_i32 : i32
    %1 = arith.extui %0 : i1 to i32
    %c0_i32_0 = arith.constant 0 : i32
    %2 = arith.cmpi ne, %1, %c0_i32_0 : i32
    scf.if %2 {
      %cst_12 = arith.constant 0x7F800000 : f32
      %42 = vector.broadcast %cst_12 : f32 to vector<8x24xf32>
      %c0_13 = arith.constant 0 : index
      %c0_14 = arith.constant 0 : index
      %43 = vector.load %arg6[%c0_13, %c0_14] : memref<8x24xf32, #tpu.memory_space<vmem>>, vector<8x24xf32>
      tpu.vector_store %arg6[%c0_13, %c0_14], %42 {strides = array<i32>} : memref<8x24xf32, #tpu.memory_space<vmem>>, vector<8x24xf32>,
    } else {
    }
    %c0 = arith.constant 0 : index
    %c0_1 = arith.constant 0 : index
    %3 = vector.load %arg3[%c0, %c0_1] : memref<24x3xf32, #tpu.memory_space<vmem>>, vector<24x3xf32>
    %c0_2 = arith.constant 0 : index
    %c0_3 = arith.constant 0 : index
    %4 = vector.load %arg4[%c0_2, %c0_3] : memref<3x24xf32, #tpu.memory_space<vmem>>, vector<3x24xf32>
    %cst = arith.constant 0.000000e+00 : f32
    %5 = vector.broadcast %cst : f32 to vector<24x24xf32>
    %6 = vector.extract_strided_slice %3 {offsets = [0, 0], sizes = [24, 1], strides = [1, 1]} : vector<24x3xf32> to vector<24x1xf32>
    %7 = vector.extract_strided_slice %4 {offsets = [0, 0], sizes = [1, 24], strides = [1, 1]} : vector<3x24xf32> to vector<1x24xf32>
    %8 = vector.broadcast %6 : vector<24x1xf32> to vector<24x24xf32>
    %9 = vector.broadcast %7 : vector<1x24xf32> to vector<24x24xf32>
    %10 = arith.subf %8, %9 : vector<24x24xf32>
    %11 = arith.mulf %10, %10 : vector<24x24xf32>
    %12 = arith.addf %5, %11 : vector<24x24xf32>
    %13 = vector.extract_strided_slice %3 {offsets = [0, 1], sizes = [24, 1], strides = [1, 1]} : vector<24x3xf32> to vector<24x1xf32>
    %14 = vector.extract_strided_slice %4 {offsets = [1, 0], sizes = [1, 24], strides = [1, 1]} : vector<3x24xf32> to vector<1x24xf32>
    %15 = vector.broadcast %13 : vector<24x1xf32> to vector<24x24xf32>
    %16 = vector.broadcast %14 : vector<1x24xf32> to vector<24x24xf32>
    %17 = arith.subf %15, %16 : vector<24x24xf32>
    %18 = arith.mulf %17, %17 : vector<24x24xf32>
    %19 = arith.addf %12, %18 : vector<24x24xf32>
    %20 = vector.extract_strided_slice %3 {offsets = [0, 2], sizes = [24, 1], strides = [1, 1]} : vector<24x3xf32> to vector<24x1xf32>
    %21 = vector.extract_strided_slice %4 {offsets = [2, 0], sizes = [1, 24], strides = [1, 1]} : vector<3x24xf32> to vector<1x24xf32>
    %22 = vector.broadcast %20 : vector<24x1xf32> to vector<24x24xf32>
    %23 = vector.broadcast %21 : vector<1x24xf32> to vector<24x24xf32>
    %24 = arith.subf %22, %23 : vector<24x24xf32>
    %25 = arith.mulf %24, %24 : vector<24x24xf32>
    %26 = arith.addf %19, %25 : vector<24x24xf32>
    %cst_4 = arith.constant 0.000000e+00 : f32
    %27 = vector.broadcast %cst_4 : f32 to vector<24x24xf32>
    %28 = arith.cmpf ogt, %26, %27 : vector<24x24xf32>
    %cst_5 = arith.constant 0x7F800000 : f32
    %29 = vector.broadcast %cst_5 : f32 to vector<24x24xf32>
    %30 = arith.select %28, %26, %29 : vector<24x24xi1>, vector<24x24xf32>
    %31 = vector.extract_strided_slice %30 {offsets = [0, 0], sizes = [8, 24], strides = [1, 1]} : vector<24x24xf32> to vector<8x24xf32>
    %32 = vector.extract_strided_slice %30 {offsets = [8, 0], sizes = [8, 24], strides = [1, 1]} : vector<24x24xf32> to vector<8x24xf32>
    %33 = arith.minimumf %31, %32 : vector<8x24xf32>
    %34 = vector.extract_strided_slice %30 {offsets = [16, 0], sizes = [8, 24], strides = [1, 1]} : vector<24x24xf32> to vector<8x24xf32>
    %35 = arith.minimumf %33, %34 : vector<8x24xf32>
    %c0_6 = arith.constant 0 : index
    %c0_7 = arith.constant 0 : index
    %36 = vector.load %arg6[%c0_6, %c0_7] : memref<8x24xf32, #tpu.memory_space<vmem>>, vector<8x24xf32>
    %37 = arith.minimumf %36, %35 : vector<8x24xf32>
    %c0_8 = arith.constant 0 : index
    %c0_9 = arith.constant 0 : index
    %38 = vector.load %arg6[%c0_8, %c0_9] : memref<8x24xf32, #tpu.memory_space<vmem>>, vector<8x24xf32>
    tpu.vector_store %arg6[%c0_8, %c0_9], %37 {strides = array<i32>} : memref<8x24xf32, #tpu.memory_space<vmem>>, vector<8x24xf32>,
    %c0_i32_10 = arith.constant 0 : i32
    %39 = arith.cmpi eq, %arg0, %c0_i32_10 : i32
    %40 = arith.extui %39 : i1 to i32
    %c0_i32_11 = arith.constant 0 : i32
    %41 = arith.cmpi ne, %40, %c0_i32_11 : i32
    scf.if %41 {
      %c0_12 = arith.constant 0 : index
      %c0_13 = arith.constant 0 : index
      %42 = vector.load %arg6[%c0_12, %c0_13] : memref<8x24xf32, #tpu.memory_space<vmem>>, vector<8x24xf32>
      %cst_14 = arith.constant dense<0x7F800000> : vector<8xf32>
      %43 = vector.multi_reduction <minimumf>, %42, %cst_14 [1] : vector<8x24xf32> to vector<8xf32>
      %44 = vector.shape_cast %43 : vector<8xf32> to vector<8x1xf32>
      %cst_15 = arith.constant dense<0x7F800000> : vector<1xf32>
      %45 = vector.multi_reduction <minimumf>, %44, %cst_15 [0] : vector<8x1xf32> to vector<1xf32>
      %46 = vector.shape_cast %45 : vector<1xf32> to vector<1x1xf32>
      %cst_16 = arith.constant 0x7F800000 : f32
      %47 = vector.broadcast %cst_16 : f32 to vector<1x1xf32>
      %48 = arith.cmpf olt, %46, %47 : vector<1x1xf32>
      %49 = math.sqrt %46 : vector<1x1xf32>
      %cst_17 = arith.constant 1.000000e-01 : f32
      %50 = vector.broadcast %cst_17 : f32 to vector<1x1xf32>
      %51 = arith.mulf %50, %49 : vector<1x1xf32>
      %cst_18 = arith.constant 0.000000e+00 : f32
      %52 = vector.broadcast %cst_18 : f32 to vector<1x1xf32>
      %53 = arith.select %48, %51, %52 : vector<1x1xi1>, vector<1x1xf32>
      %c0_19 = arith.constant 0 : index
      %c0_20 = arith.constant 0 : index
      %54 = vector.load %arg5[%c0_19, %c0_20] : memref<1x1xf32, #tpu.memory_space<vmem>>, vector<1x1xf32>
      tpu.vector_store %arg5[%c0_19, %c0_20], %53 {strides = array<i32>} : memref<1x1xf32, #tpu.memory_space<vmem>>, vector<1x1xf32>,
    } else {
    }
    return
  }
  func.func @transform_0(%arg0: i32, %arg1: memref<1xi32, #tpu.memory_space<smem>>, %arg2: memref<1xi32, #tpu.memory_space<smem>>) -> (i32, i32) {
    %0 = arith.index_cast %arg0 : i32 to index
    %1 = memref.load %arg1[%0] : memref<1xi32, #tpu.memory_space<smem>>
    %c0_i32 = arith.constant 0 : i32
    %c0_i32_0 = arith.constant 0 : i32
    return %1, %c0_i32 : i32, i32
  }
  func.func @transform_1(%arg0: i32, %arg1: memref<1xi32, #tpu.memory_space<smem>>, %arg2: memref<1xi32, #tpu.memory_space<smem>>) -> (i32, i32) {
    %0 = arith.index_cast %arg0 : i32 to index
    %1 = memref.load %arg2[%0] : memref<1xi32, #tpu.memory_space<smem>>
    %c0_i32 = arith.constant 0 : i32
    %c0_i32_0 = arith.constant 0 : i32
    return %c0_i32, %1 : i32, i32
  }
  func.func @transform_2(%arg0: i32, %arg1: memref<1xi32, #tpu.memory_space<smem>>, %arg2: memref<1xi32, #tpu.memory_space<smem>>) -> (i32, i32) {
    %c0_i32 = arith.constant 0 : i32
    %c0_i32_0 = arith.constant 0 : i32
    %c0_i32_1 = arith.constant 0 : i32
    return %c0_i32, %c0_i32_0 : i32, i32
  }
}

</mosaic_0001>

<bundles_post_ra>
// kernel: tpu_custom_call.1
= control target key start
LH: loop header
LB: loop body
LE: loop exit
PB: predicated region body
PF: predicated region fallthrough
CT: control target
= control target key end

     0   :  { %v246_v0 = vmov 1   ;;  %v247_v1 = vmov 0   ;;  %s297_s0 = inlined_call_operand.<no memory space> [shape: s32[1], index: 0, kind: input, shape index: {}]   ;;  %s298_s1 = inlined_call_operand.<no memory space> [shape: s32[1], index: 1, kind: input, shape index: {}]   ;;  %s299_s2 = inlined_call_operand.vmem [shape: f32[24,3], index: 2, kind: input, shape index: {}]   ;;  %s300_s3 = inlined_call_operand.vmem [shape: f32[3,24], index: 3, kind: input, shape index: {}]   ;;  %s301_s4 = inlined_call_operand.hbm [shape: f32[1,1], index: 4, kind: output, shape index: {}]  }
   0x1   :  { %s42_s17 = smul.u32 3, %s297_s0  ;;  %212 = vset.pattern.permute.xlu1 %v246_v0  ;;  %211 = vset.pattern.permute.xlu0 %v247_v1 }
   0x2   :  { %11 = vsyncpa [#allocation7], 0  ;;  %213 = vset.pattern.permute.xlu2 %v247_v1  ;;  %v248_v5 = vmov 2   ;;  %p50_p1 = scmp.lt.s32.totalorder %s298_s1, 0  ;;  %vm59_vm0 = vcmask 195584   ;;  %v249_v7 = vmov inf  }
   0x3   :  { %p43_p0 = scmp.lt.s32.totalorder %s42_s17, 2  ;;  %60 = vst.msk [vmem:[#allocation2] sm:$0xff] %vm59_vm0, %v249_v7  ;;  %s183_s30 = sshll.u32 %s301_s4, 4  ;;  %vm174_vm6 = vcmask 0   ;;  %s184_s30 = int_to_ptr.hbm [resolvable:$true] %s183_s30 }
   0x4   :  { %s305_s1 = smov (!%p50_p1, %s298_s1), 0 }
   0x5   :  { %s303_s17 = smov (!%p43_p0, %s42_s17), 2  ;;  %s205_s24 = sshll.u32 %s305_s1, 2 }
   0x6   :  { %s204_s18 = sshll.u32 %s303_s17, 3  ;;  %s53_s27 = scalar_lea.vmem %s300_s3, %s205_s24 }
   0x7   :  { %s46_s21 = scalar_lea.vmem %s299_s2, %s204_s18  ;;  %v64_v9 = vld [vmem:[%s53_s27] sm:$0x7]  ;;  %s250_s1 = smov [#allocation6]  }
   0x8   :  { %v61_v2 = vld [vmem:[%s46_s21] sm:$0xff]  ;;  %v63_v3 = vld [vmem:[%s46_s21 + $0x10] sm:$0xff]  ;;  %v62_v4 = vld [vmem:[%s46_s21 + $0x8] sm:$0xff]  ;;  %v80_v12 = vperm.slane %v64_v9, 0  ;;  %v102_v13 = vperm.slane %v64_v9, 1  ;;  %v124_v16 = vperm.slane %v64_v9, 2 }
   0x9   :  { %91 = vperm.xlu1 %212, %v61_v2   ;;  %67 = vperm.xlu0 %211, %v61_v2   ;;  %s181_s3 = sshll.u32 %s250_s1, 4  ;;  %s182_s3 = int_to_ptr.vmem [resolvable:$true] %s181_s3 }
   0xa   :  { %77 = vperm.xlu2 %213, %v63_v3   ;;  %v142_v48 = vld [vmem:[#allocation2] sm:$0xff] }
  0x11   :  { %95 = vperm.xlu1 %212, %v62_v4   ;;  %72 = vperm.xlu0 %211, %v62_v4  }
  0x12   :  { %214 = vset.pattern.permute.xlu2 %v246_v0 }
  0x13   :  { %99 = vperm.xlu2 %214, %v63_v3  }
  0x19   :  { %216 = vset.pattern.permute.xlu1 %v248_v5  ;;  %215 = vset.pattern.permute.xlu0 %v248_v5 }
  0x1a   :  { %117 = vperm.xlu1 %216, %v62_v4   ;;  %113 = vperm.xlu0 %215, %v61_v2  }
  0x1b   :  { %217 = vset.pattern.permute.xlu2 %v248_v5 }
  0x1c   :  { %121 = vperm.xlu2 %217, %v63_v3  }
  0x64   :  { %v78_v6 = vpop.permute.xlu2 %77 }
  0x65   :  { %v83_v14 = vsub.f32 %v78_v6, %v80_v12 }
  0x67   :  { %v86_v20 = vmul.f32 %v83_v14, %v83_v14 }
  0x6d   :  { %v100_v8 = vpop.permute.xlu2 %99 }
  0x6e   :  { %v105_v15 = vsub.f32 %v100_v8, %v102_v13 }
  0x70   :  { %v108_v21 = vmul.f32 %v105_v15, %v105_v15 }
  0x72   :  { %v111_v27 = vadd.f32 %v108_v21, %v86_v20 }
  0x76   :  { %v122_v17 = vpop.permute.xlu2 %121 }
  0x77   :  { %v127_v22 = vsub.f32 %v122_v17, %v124_v16 }
  0x79   :  { %v130_v28 = vmul.f32 %v127_v22, %v127_v22 }
  0x7b   :  { %v92_v10 = vpop.permute.xlu1 %91  ;;  %v68_v11 = vpop.permute.xlu0 %67  ;;  %v133_v37 = vadd.f32 %v130_v28, %v111_v27 }
  0x7c   :  { %v103_v23 = vsub.f32 %v92_v10, %v102_v13  ;;  %v81_v24 = vsub.f32 %v68_v11, %v80_v12 }
  0x7d   :  { %vm136_vm1 = vcmp.gt.f32.partialorder %v133_v37, 0.0 }
  0x7e   :  { %v106_v29 = vmul.f32 %v103_v23, %v103_v23  ;;  %v84_v30 = vmul.f32 %v81_v24, %v81_v24  ;;  %v139_v47 = vsel %vm136_vm1, %v133_v37, inf }
  0x80   :  { %v109_v38 = vadd.f32 %v106_v29, %v84_v30 }
  0x83   :  { %v96_v18 = vpop.permute.xlu1 %95  ;;  %v73_v19 = vpop.permute.xlu0 %72 }
  0x84   :  { %v104_v25 = vsub.f32 %v96_v18, %v102_v13  ;;  %v82_v26 = vsub.f32 %v73_v19, %v80_v12 }
  0x86   :  { %v107_v31 = vmul.f32 %v104_v25, %v104_v25  ;;  %v85_v32 = vmul.f32 %v82_v26, %v82_v26 }
  0x88   :  { %v110_v39 = vadd.f32 %v107_v31, %v85_v32 }
  0x8c   :  { %v118_v33 = vpop.permute.xlu1 %117  ;;  %v114_v34 = vpop.permute.xlu0 %113 }
  0x8d   :  { %v126_v35 = vsub.f32 %v118_v33, %v124_v16  ;;  %v125_v36 = vsub.f32 %v114_v34, %v124_v16 }
  0x8f   :  { %v129_v40 = vmul.f32 %v126_v35, %v126_v35  ;;  %v128_v41 = vmul.f32 %v125_v36, %v125_v36 }
  0x91   :  { %v132_v42 = vadd.f32 %v129_v40, %v110_v39  ;;  %v131_v43 = vadd.f32 %v128_v41, %v109_v38 }
  0x93   :  { %vm135_vm2 = vcmp.gt.f32.partialorder %v132_v42, 0.0  ;;  %vm134_vm3 = vcmp.gt.f32.partialorder %v131_v43, 0.0 }
  0x94   :  { %v138_v44 = vsel %vm135_vm2, %v132_v42, inf  ;;  %v137_v45 = vsel %vm134_vm3, %v131_v43, inf }
  0x95   :  { %v140_v46 = vmin.f32 %v137_v45, %v138_v44 }
  0x97   :  { %v141_v49 = vmin.f32 %v140_v46, %v139_v47 }
  0x99   :  { %v143_v50 = vmin.f32 %v142_v48, %v141_v49 }
  0x9b   :  { %145 = vst.msk [vmem:[#allocation2] sm:$0xff] %vm59_vm0, %v143_v50 }
  0xa2   :  { %v149_v51 = vld [vmem:[#allocation2] sm:$0xff] }
  0xa3   :  { %v150_v52 = vsel %vm59_vm0, %v149_v51, inf }
  0xa4   :  { %151 = vmin.xlane.f32.xlu1 %v150_v52 }
 0x117   :  { %v152_v53 = vpop.xlane.xlu1 %151 }
 0x118   :  { %v153_v54 = vrot.slane %v152_v53, 4 }
 0x11a   :  { %v154_v55 = vmin.f32 %v152_v53, %v153_v54 }
 0x11c   :  { %v155_v56 = vrot.slane %v154_v55, 2 }
 0x11e   :  { %v156_v57 = vmin.f32 %v154_v55, %v155_v56 }
 0x120   :  { %v157_v58 = vrot.slane %v156_v57, 1 }
 0x122   :  { %v158_v59 = vmin.f32 %v156_v57, %v157_v58 }
 0x124   :  { %218 = vrsqrt.f32 %v158_v59  ;;  %vm167_vm4 = vcmp.eq.f32.partialorder %v158_v59, inf  ;;  %v170_v3 = vand.u32 2147483648, %v158_v59  ;;  %vm169_vm5 = vcmp.eq.f32.partialorder %v158_v59, 0.0 }
 0x125   :  { %vm159_vm7 = vcmp.lt.f32.partialorder %v158_v59, inf }
 0x12a   :  { %v219_v60 = vpop.eup %218 }
 0x12b   :  { %v161_v61 = vmul.f32 %v219_v60, %v158_v59 }
 0x12d   :  { %v162_v62 = vmul.f32 %v219_v60, %v161_v61 }
 0x12f   :  { %v163_v63 = vmul.f32 0.5, %v162_v62 }
 0x131   :  { %v164_v0 = vsub.f32 1.5, %v163_v63 }
 0x133   :  { %v165_v1 = vmul.f32 %v219_v60, %v164_v0 }
 0x135   :  { %v166_v2 = vmul.f32 %v165_v1, %v158_v59 }
 0x137   :  { %v168_v4 = vsel %vm167_vm4, %v158_v59, %v166_v2 }
 0x138   :  { %v171_v5 = vsel %vm169_vm5, %v170_v3, %v168_v4 }
 0x139   :  { %v172_v6 = vmul.f32 0.1, %v171_v5 }
 0x13b   :  { %v173_v7 = vsel %vm159_vm7, %v172_v6, 0.0 }
 0x13c   :  { %175 = vst.msk [vmem:[#allocation6] sm:$0x1] %vm174_vm6, %v173_v7 }
 0x13d   :  { %186 = dma.vmem_to_hbm [thread:$0]  %s182_s3, 16, %s184_s30, [#allocation7]  }
 0x13e   :  { %244 = dma.done.wait [#allocation7], 16  }
 0x13f   :  { %245 = vsyncadd [#allocation7], 4294967280 }
 0x140   :  { %191 = vsyncpa [#allocation7], 1 }

</bundles_post_ra>
